<compile_context>
chip_gen: v5e
topology: v5e:2x2
jax: 0.10.0
libtpu: 0.0.40
codegen_flags: <defaults>
</compile_context>

<pallas_src>
import math
from functools import partial

import jax
import jax.numpy as jnp
from jax.experimental import pallas as pl
from jax.experimental.pallas import tpu as pltpu


def _next_pow2(n: int) -> int:
    return 1 if n <= 1 else 1 << (n - 1).bit_length()


def _floor_pow2(n: int) -> int:
    return 1 << (n.bit_length() - 1)


def _num_tensorcores_per_device() -> int:
    # v7x (and v4/v5p megacore) expose 2 TensorCores per JAX device; v5e/v6e have 1.
    # Heuristic on device_kind; a wrong guess only costs one ~0.35us grid step.
    try:
        kind = jax.devices()[0].device_kind.lower()
    except Exception:
        return 1
    return 2 if any(tag in kind for tag in ("v7", "v4", "v5p")) else 1


_NUM_TC = _num_tensorcores_per_device()


def _rope_table_config(half_dim: int, num_positions: int):
    """Static tiling config: (fold, w, s_folded, tile_rows)."""
    # Fold enough consecutive positions into the lane axis that the last dim is a
    # multiple of 128 (lane-dense, unmasked stores).
    fold = 128 // math.gcd(half_dim, 128)              # power of two
    w = fold * half_dim                                # = lcm(half_dim, 128)

    # Folded row count: bucket to a power of two (>= 8) to bound recompiles and
    # satisfy the (8, 128) block constraint.
    s_folded = max(8, _next_pow2(-(-num_positions // fold)))

    # ~2 MiB per output tile: 3 outputs x 2 (double-buffer) x 2 MiB = 12 MiB, which
    # stays under v5e's 16 MiB scoped-VMEM default (v6e/v7x have more headroom).
    max_rows_by_bytes = max(8, _floor_pow2(max(8, (2 << 20) // (w * 4))))
    tile_rows = min(s_folded, max_rows_by_bytes)       # powers of two -> divides s_folded

    # v7x: keep at least 2 tiles so dimension_semantics=("parallel",) actually splits
    # the writeback across both TensorCores. No extra steps on v5e/v6e.
    if _NUM_TC >= 2 and s_folded // tile_rows < 2 and tile_rows >= 16:
        tile_rows //= 2
    return fold, w, s_folded, tile_rows


def _rope_tables_kernel(aux_ref, freqs_ref, cos_ref, sin_ref, *, fold: int, tile_rows: int):
    # aux_ref : (2, W) resident — row 0 = inv_freq tiled across the fold,
    #                              row 1 = position-within-fold (integers).
    # outputs : (tile_rows, W) lane-dense folded tiles; folded row r of grid block i
    #           holds positions [ (i*tile_rows + r)*fold , ... + fold ).
    inv_freq_row = aux_ref[0:1, :]                                    # (1, W)
    block_base = (pl.program_id(0) * (tile_rows * fold)).astype(jnp.float32)
    base_plus_pos = block_base + aux_ref[1:2, :]                      # (1, W): one add/step
    row = jax.lax.broadcasted_iota(jnp.int32, freqs_ref.shape, 0).astype(jnp.float32)
    pos = row * float(fold) + base_plus_pos                           # exact integers in f32
    freqs = pos * inv_freq_row                                        # single rounding == torch.outer
    freqs_ref[...] = freqs
    # cos/sin use the otherwise-idle EUP/VPU slots; downstream rotary-apply consumes
    # them in f32, so emitting them here removes a full later table read + write.
    cos_ref[...] = jnp.cos(freqs)
    sin_ref[...] = jnp.sin(freqs)


@partial(jax.jit, static_argnames=("half_dim", "fold", "s_folded", "tile_rows"))
def _build_rope_tables(aux, *, half_dim: int, fold: int, s_folded: int, tile_rows: int):
    """Return (freqs, cos, sin), each (s_folded*fold, half_dim) float32."""
    w = fold * half_dim
    grid = s_folded // tile_rows
    tile_bytes = tile_rows * w * 4
    vmem_limit = max(16 << 20, 3 * 2 * tile_bytes + (1 << 20))        # outputs double-buffered

    kernel = partial(_rope_tables_kernel, fold=fold, tile_rows=tile_rows)
    out_shape = tuple(jax.ShapeDtypeStruct((s_folded, w), jnp.float32) for _ in range(3))
    out_spec = pl.BlockSpec((tile_rows, w), lambda i: (i, 0))

    freqs_f, cos_f, sin_f = pl.pallas_call(
        kernel,
        out_shape=out_shape,
        grid=(grid,),
        in_specs=[pl.BlockSpec((2, w), lambda i: (0, 0))],            # stays resident
        out_specs=[out_spec, out_spec, out_spec],
        compiler_params=pltpu.CompilerParams(
            dimension_semantics=("parallel",),                        # v7x: 2 TCs split the grid
            vmem_limit_bytes=min(48 << 20, vmem_limit),
        ),
    )(aux)

    # Row-major unfold back to (positions, half_dim); metadata-only under jit.
    n = s_folded * fold
    return (freqs_f.reshape(n, half_dim),
            cos_f.reshape(n, half_dim),
            sin_f.reshape(n, half_dim))


class Qwen2VisionRotaryEmbedding:
    """JAX/Pallas port of the PyTorch module (including the seqlen*2 cache)."""

    def __init__(self, dim: int, theta: float = 10000.0) -> None:
        self.dim = dim
        self.theta = theta
        self.half_dim = dim // 2
        # Buffer setup (glue, deterministic, matches torch __init__).
        self.inv_freq = 1.0 / (
            theta ** (jnp.arange(0, dim, 2, dtype=jnp.float32) / dim)
        )
        # Aux rows depend only on dim -> hoisted out of the per-rebuild path.
        self._fold = 128 // math.gcd(self.half_dim, 128)
        inv_tiled = jnp.tile(self.inv_freq, self._fold)                               # (W,)
        pos_in_fold = jnp.repeat(jnp.arange(self._fold, dtype=jnp.float32),
                                 self.half_dim)                                       # (W,)
        self._aux = jnp.stack([inv_tiled, pos_in_fold], axis=0)                       # (2, W)

        self._seq_len_cached = 0
        self._freqs_cached = None
        self._cos_cached = None
        self._sin_cached = None
        self._slice_cache = {}

    def update_freqs_cache(self, seqlen: int) -> None:
        if seqlen > self._seq_len_cached:
            seqlen *= 2  # torch doubles the cached length
            fold, _, s_folded, tile_rows = _rope_table_config(self.half_dim, seqlen)
            covered = s_folded * fold
            # f32 position math is exact only up to 2^24 positions.
            assert covered <= (1 << 24), "position ids exceed exact f32 range"
            freqs, cos, sin = _build_rope_tables(
                self._aux, half_dim=self.half_dim, fold=fold,
                s_folded=s_folded, tile_rows=tile_rows)
            self._freqs_cached, self._cos_cached, self._sin_cached = freqs, cos, sin
            # Record the full covered (bucketed) length so growing requests rarely
            # rebuild and never recompile within the same bucket.
            self._seq_len_cached = covered
            self._slice_cache = {}

    def _get_slices(self, seqlen: int):
        self.update_freqs_cache(seqlen)
        hit = self._slice_cache.get(seqlen)
        if hit is None:
            hit = (self._freqs_cached[:seqlen],
                   self._cos_cached[:seqlen],
                   self._sin_cached[:seqlen])
            self._slice_cache[seqlen] = hit
        return hit

    def __call__(self, seqlen: int) -> jax.Array:
        """Matches torch forward: (seqlen, dim//2) float32 freqs table."""
        return self._get_slices(seqlen)[0]

    def cos_sin(self, seqlen: int):
        """Fused extra outputs for the downstream rotary-apply (f32 cos/sin)."""
        _, c, s = self._get_slices(seqlen)
        return c, s


if __name__ == "__main__":
    # PRNGKey used only for determinism convention; this module has no random params.
    _ = jax.random.PRNGKey(0)

    def _ref_freqs(dim, theta, seqlen):
        inv = 1.0 / (theta ** (jnp.arange(0, dim, 2, dtype=jnp.float32) / dim))
        return jnp.outer(jnp.arange(seqlen, dtype=jnp.float32), inv)

    # Case 1: small shapes consistent with the module (dim=32 -> half_dim=16).
    rope = Qwen2VisionRotaryEmbedding(dim=32, theta=10000.0)
    freqs = jax.block_until_ready(rope(8))
    ref = _ref_freqs(32, 10000.0, 8)
    assert freqs.shape == (8, 16), freqs.shape
    assert freqs.dtype == jnp.float32, freqs.dtype
    assert jnp.allclose(freqs, ref, atol=1e-6, rtol=1e-6)
    cos, sin = rope.cos_sin(8)
    assert jnp.allclose(cos, jnp.cos(ref), atol=1e-5, rtol=1e-5)
    assert jnp.allclose(sin, jnp.sin(ref), atol=1e-5, rtol=1e-5)

    # Case 2: non-power-of-two half_dim (Qwen2-VL head_dim=80 -> rotary dim=40, half=20).
    rope2 = Qwen2VisionRotaryEmbedding(dim=40, theta=10000.0)
    freqs2 = jax.block_until_ready(rope2(24))
    assert freqs2.shape == (24, 20), freqs2.shape
    assert jnp.allclose(freqs2, _ref_freqs(40, 10000.0, 24), atol=1e-6, rtol=1e-6)

    # Case 3: long table (validates per-block offsets when the grid has >1 step, e.g. v7x).
    rope3 = Qwen2VisionRotaryEmbedding(dim=32, theta=10000.0)
    freqs3 = jax.block_until_ready(rope3(8192))
    assert freqs3.shape == (8192, 16), freqs3.shape
    assert jnp.allclose(freqs3, _ref_freqs(32, 10000.0, 8192), atol=1e-5, rtol=1e-6)

    # Cache behavior: smaller follow-up requests must not rebuild, and repeated calls
    # with the same seqlen must not re-slice (same cached array object).
    cached_len = rope3._seq_len_cached
    first = rope3(4096)
    assert rope3._seq_len_cached == cached_len
    assert rope3(4096) is first

    print("KERNEL_OK")
</pallas_src>

<mosaic_0001>
module attributes {stable_mosaic.version = 11 : i64} {
  func.func @_rope_tables_kernel(%arg0: i32, %arg1: memref<2x128xf32, #tpu.memory_space<vmem>>, %arg2: memref<8x128xf32, #tpu.memory_space<vmem>>, %arg3: memref<8x128xf32, #tpu.memory_space<vmem>>, %arg4: memref<8x128xf32, #tpu.memory_space<vmem>>) attributes {dimension_semantics = [#tpu.dimension_semantics<parallel>], iteration_bounds = array<i64: 1>, scalar_prefetch = 0 : i64, scratch_operands = 0 : i64, tpu.core_type = #tpu.core_type<tc>, window_params = [{pipeline_mode = #tpu.pipeline_mode<synchronous>, transform_indices = @transform_0, window_bounds = array<i64: 2, 128>}, {transform_indices = @transform_1, window_bounds = array<i64: 8, 128>}, {transform_indices = @transform_2, window_bounds = array<i64: 8, 128>}, {transform_indices = @transform_3, window_bounds = array<i64: 8, 128>}]} {
    %c0 = arith.constant 0 : index
    %c0_0 = arith.constant 0 : index
    %0 = vector.load %arg1[%c0, %c0_0] : memref<2x128xf32, #tpu.memory_space<vmem>>, vector<1x128xf32>
    %c64_i32 = arith.constant 64 : i32
    %1 = arith.muli %arg0, %c64_i32 : i32
    %2 = arith.sitofp %1 : i32 to f32
    %c1 = arith.constant 1 : index
    %c0_1 = arith.constant 0 : index
    %3 = vector.load %arg1[%c1, %c0_1] : memref<2x128xf32, #tpu.memory_space<vmem>>, vector<1x128xf32>
    %4 = vector.broadcast %2 : f32 to vector<1x128xf32>
    %5 = arith.addf %4, %3 : vector<1x128xf32>
    %6 = tpu.iota {dimensions = array<i32: 0>} : vector<8x128xi32>
    %7 = arith.sitofp %6 : vector<8x128xi32> to vector<8x128xf32>
    %cst = arith.constant 8.000000e+00 : f32
    %8 = vector.broadcast %cst : f32 to vector<8x128xf32>
    %9 = arith.mulf %7, %8 : vector<8x128xf32>
    %10 = vector.broadcast %5 : vector<1x128xf32> to vector<8x128xf32>
    %11 = arith.addf %9, %10 : vector<8x128xf32>
    %12 = vector.broadcast %0 : vector<1x128xf32> to vector<8x128xf32>
    %13 = arith.mulf %11, %12 : vector<8x128xf32>
    %c0_2 = arith.constant 0 : index
    %c0_3 = arith.constant 0 : index
    %14 = vector.load %arg2[%c0_2, %c0_3] : memref<8x128xf32, #tpu.memory_space<vmem>>, vector<8x128xf32>
    tpu.vector_store %arg2[%c0_2, %c0_3], %13 {strides = array<i32>} : memref<8x128xf32, #tpu.memory_space<vmem>>, vector<8x128xf32>,
    %15 = math.cos %13 : vector<8x128xf32>
    %c0_4 = arith.constant 0 : index
    %c0_5 = arith.constant 0 : index
    %16 = vector.load %arg3[%c0_4, %c0_5] : memref<8x128xf32, #tpu.memory_space<vmem>>, vector<8x128xf32>
    tpu.vector_store %arg3[%c0_4, %c0_5], %15 {strides = array<i32>} : memref<8x128xf32, #tpu.memory_space<vmem>>, vector<8x128xf32>,
    %17 = math.sin %13 : vector<8x128xf32>
    %c0_6 = arith.constant 0 : index
    %c0_7 = arith.constant 0 : index
    %18 = vector.load %arg4[%c0_6, %c0_7] : memref<8x128xf32, #tpu.memory_space<vmem>>, vector<8x128xf32>
    tpu.vector_store %arg4[%c0_6, %c0_7], %17 {strides = array<i32>} : memref<8x128xf32, #tpu.memory_space<vmem>>, vector<8x128xf32>,
    return
  }
  func.func @transform_0(%arg0: i32) -> (i32, i32) {
    %c0_i32 = arith.constant 0 : i32
    %c0_i32_0 = arith.constant 0 : i32
    %c0_i32_1 = arith.constant 0 : i32
    return %c0_i32, %c0_i32_0 : i32, i32
  }
  func.func @transform_1(%arg0: i32) -> (i32, i32) {
    %c0_i32 = arith.constant 0 : i32
    %c0_i32_0 = arith.constant 0 : i32
    return %arg0, %c0_i32 : i32, i32
  }
  func.func @transform_2(%arg0: i32) -> (i32, i32) {
    %c0_i32 = arith.constant 0 : i32
    %c0_i32_0 = arith.constant 0 : i32
    return %arg0, %c0_i32 : i32, i32
  }
  func.func @transform_3(%arg0: i32) -> (i32, i32) {
    %c0_i32 = arith.constant 0 : i32
    %c0_i32_0 = arith.constant 0 : i32
    return %arg0, %c0_i32 : i32, i32
  }
}

</mosaic_0001>

<bundles_post_ra>
// kernel: _build_rope_tables.1
= control target key start
LH: loop header
LB: loop body
LE: loop exit
PB: predicated region body
PF: predicated region fallthrough
CT: control target
= control target key end

     0   :  { %9 = vsyncpa [#allocation3], 0  ;;  %s406_s15 = smov [#allocation2]   ;;  %s493_s0 = inlined_call_operand.hbm [shape: f32[2,128], index: 0, kind: input, shape index: {}]   ;;  %s494_s1 = inlined_call_operand.vmem [shape: f32[8,128], index: 1, kind: output, shape index: {0}]   ;;  %s495_s2 = inlined_call_operand.vmem [shape: f32[8,128], index: 2, kind: output, shape index: {1}]   ;;  %s496_s3 = inlined_call_operand.vmem [shape: f32[8,128], index: 3, kind: output, shape index: {2}]  }
   0x1   :  { %s15_s14 = sshll.u32 %s493_s0, 4  ;;  %s17_s16 = sshll.u32 %s406_s15, 4  ;;  %s16_s14 = int_to_ptr.hbm [resolvable:$true] %s15_s14  ;;  %s18_s16 = int_to_ptr.vmem [resolvable:$true] %s17_s16 }
   0x2   :  { %20 = dma.hbm_to_vmem [thread:$0]  %s16_s14, 32, %s18_s16, [#allocation3]  }
   0x3   :  { %404 = dma.done.wait [#allocation3], 32  }
   0x4   :  { %405 = vsyncadd [#allocation3], 4294967264  ;;  %v31_v0 = vlaneseq  ;;  %v378_v4 = vld [vmem:[#allocation2 + $0x1] ss:$0 sm:$0xff]  ;;  %v379_v5 = vld [vmem:[#allocation2] ss:$0 sm:$0xff] }
   0x5   :  { %v407_v19 = vmov 683565275   ;;  %v408_v21 = vmov 2475754826   ;;  %v409_v23 = vmov 2131351028  }
   0x6   :  { %v32_v1 = vshrl.u32 %v31_v0, 7  ;;  %v410_v25 = vmov 2102212464   ;;  %v411_v27 = vmov 920167782  }
   0x7   :  { %v412_v33 = vmov 1326507024  }
   0x8   :  { %v33_v2 = vcvt.s32.f32 %v32_v1 }
   0xa   :  { %v34_v3 = vmul.f32 8.0, %v33_v2 }
   0xc   :  { %v36_v6 = vadd.f32 %v378_v4, %v34_v3 }
   0xe   :  { %v437_v7 = vmul.f32 %v379_v5, %v36_v6 }
  0x10   :  { %39 = vst [vmem:[%s494_s1] sm:$0xff] %v437_v7  ;;  %v43_v8 = vand.u32 2139095040, %v437_v7  ;;  %v40_v10 = vand.u32 2147483647, %v437_v7  ;;  %vm42_vm12 = vcmp.lt.s32.totalorder %v437_v7, 0 }
  0x12   :  { %v44_v9 = vshrl.u32 %v43_v8, 23  ;;  %v47_v13 = vand.u32 8388607, %v40_v10  ;;  %v413_v8 = vmov 0   ;;  %vm41_vm13 = vcmp.le.f32.partialorder %v40_v10, 0.7853982 }
  0x14   :  { %v364_v11 = vadd.s32 4294967169, %v44_v9  ;;  %v48_v16 = vor.u32 8388608, %v47_v13 }
  0x16   :  { %v50_v12 = vadd.s32 1, %v364_v11  ;;  %v450_v35 = vshll.u32 %v48_v16, 8 }
  0x18   :  { %vm51_vm0 = vcmp.gt.s32.totalorder %v50_v12, 0  ;;  %v89_v47 = vand.u32 65535, %v450_v35  ;;  %v90_v48 = vshrl.u32 %v450_v35, 16 }
  0x19   :  { %v52_v14 = vsel %vm51_vm0, %v50_v12, 0 }
  0x1a   :  { %v54_v15 = vand.u32 31, %v52_v14  ;;  %v447_v17 = vshrl.u32 %v52_v14, 5 }
  0x1c   :  { %v55_v18 = vsub.s32 32, %v54_v15  ;;  %v57_v20 = vshll.u32 %v407_v19, %v54_v15  ;;  %v60_v22 = vshll.u32 %v408_v21, %v54_v15  ;;  %v63_v24 = vshll.u32 %v409_v23, %v54_v15 }
  0x1d   :  { %v66_v26 = vshll.u32 %v410_v25, %v54_v15  ;;  %v69_v28 = vshll.u32 %v411_v27, %v54_v15  ;;  %vm72_vm1 = vcmp.lt.s32.totalorder %v447_v17, 1  ;;  %vm75_vm2 = vcmp.lt.s32.totalorder %v447_v17, 4 }
  0x1e   :  { %v58_v29 = vshrl.u32 %v408_v21, %v55_v18  ;;  %v61_v30 = vshrl.u32 %v409_v23, %v55_v18  ;;  %v64_v31 = vshrl.u32 %v410_v25, %v55_v18  ;;  %v67_v32 = vshrl.u32 %v411_v27, %v55_v18 }
  0x1f   :  { %v70_v34 = vshrl.u32 %v412_v33, %v55_v18  ;;  %vm74_vm3 = vcmp.lt.s32.totalorder %v447_v17, 3  ;;  %vm73_vm4 = vcmp.lt.s32.totalorder %v447_v17, 2  ;;  %v56_v55 = vshrl.u32 %v407_v19, %v55_v18 }
  0x20   :  { %v59_v36 = vor.u32 %v58_v29, %v57_v20  ;;  %v62_v37 = vor.u32 %v61_v30, %v60_v22  ;;  %v65_v38 = vor.u32 %v64_v31, %v63_v24  ;;  %v68_v39 = vor.u32 %v67_v32, %v66_v26 }
  0x21   :  { %v71_v40 = vor.u32 %v70_v34, %v69_v28 }
  0x22   :  { %v80_v41 = vsel %vm72_vm1, %v59_v36, %v62_v37  ;;  %v84_v42 = vsel %vm72_vm1, %v62_v37, %v65_v38  ;;  %v81_v43 = vsel %vm75_vm2, %v68_v39, 920167782  ;;  %v76_v4 = vsel %vm72_vm1, %v56_v55, %v59_v36 }
  0x23   :  { %v85_v44 = vsel %vm75_vm2, %v71_v40, 1326507024  ;;  %v82_v45 = vsel %vm74_vm3, %v65_v38, %v81_v43  ;;  %v77_v6 = vsel %vm75_vm2, %v65_v38, 2102212464 }
  0x24   :  { %v86_v46 = vsel %vm74_vm3, %v68_v39, %v85_v44  ;;  %v83_v49 = vsel %vm73_vm4, %v80_v41, %v82_v45  ;;  %v78_v19 = vsel %vm74_vm3, %v62_v37, %v77_v6 }
  0x25   :  { %v87_v50 = vsel %vm73_vm4, %v84_v42, %v86_v46  ;;  %v113_v53 = vand.u32 65535, %v83_v49  ;;  %v114_v54 = vshrl.u32 %v83_v49, 16  ;;  %v79_v27 = vsel %vm73_vm4, %v76_v4, %v78_v19 }
  0x26   :  { %v91_v51 = vand.u32 65535, %v87_v50  ;;  %v92_v52 = vshrl.u32 %v87_v50, 16  ;;  %v133_v31 = vmul.u32 %v450_v35, %v79_v27  ;;  %vm183_vm4 = vweird.f32 %v437_v7 }
  0x27   :  { %v115_v59 = vmul.u32 %v113_v53, %v89_v47  ;;  %v116_v60 = vmul.u32 %v114_v54, %v89_v47  ;;  %v117_v61 = vmul.u32 %v113_v53, %v90_v48  ;;  %v118_v1 = vmul.u32 %v114_v54, %v90_v48 }
  0x28   :  { %v93_v56 = vmul.u32 %v91_v51, %v89_v47  ;;  %v94_v57 = vmul.u32 %v92_v52, %v89_v47  ;;  %v95_v58 = vmul.u32 %v91_v51, %v90_v48  ;;  %v96_v62 = vmul.u32 %v92_v52, %v90_v48 }
  0x29   :  { %v119_v2 = vshll.u32 %v116_v60, 16  ;;  %v121_v3 = vshll.u32 %v117_v61, 16  ;;  %v120_v16 = vshrl.u32 %v116_v60, 16  ;;  %v122_v23 = vshrl.u32 %v117_v61, 16 }
  0x2a   :  { %v97_v63 = vshll.u32 %v94_v57, 16  ;;  %v99_v0 = vshll.u32 %v95_v58, 16  ;;  %v98_v12 = vshrl.u32 %v94_v57, 16  ;;  %v100_v20 = vshrl.u32 %v95_v58, 16 }
  0x2b   :  { %vm123_vm6 = vc.u32 %v115_v59, %v119_v2  ;;  %v125_v11 = vadd.s32 %v119_v2, %v115_v59 }
  0x2c   :  { %vm101_vm5 = vc.u32 %v93_v56, %v97_v63  ;;  %v103_v5 = vadd.s32 %v97_v63, %v93_v56  ;;  %v124_v14 = vsel %vm123_vm6, 1, %v413_v8 }
  0x2d   :  { %v102_v9 = vsel %vm101_vm5, 1, %v413_v8  ;;  %v126_v18 = vadd.s32 %v124_v14, %v118_v1  ;;  %vm127_vm8 = vc.u32 %v125_v11, %v121_v3  ;;  %v129_v26 = vadd.s32 %v125_v11, %v121_v3 }
  0x2e   :  { %v104_v13 = vadd.s32 %v102_v9, %v96_v62  ;;  %vm105_vm7 = vc.u32 %v103_v5, %v99_v0  ;;  %v128_v22 = vsel %vm127_vm8, 1, %v413_v8 }
  0x2f   :  { %v106_v15 = vsel %vm105_vm7, 1, %v413_v8  ;;  %v130_v24 = vadd.s32 %v128_v22, %v126_v18 }
  0x30   :  { %v108_v21 = vadd.s32 %v106_v15, %v104_v13 }
  0x31   :  { %v131_v28 = vadd.s32 %v130_v24, %v120_v16 }
  0x32   :  { %v109_v25 = vadd.s32 %v108_v21, %v98_v12 }
  0x33   :  { %v132_v30 = vadd.s32 %v131_v28, %v122_v23 }
  0x34   :  { %v110_v29 = vadd.s32 %v109_v25, %v100_v20 }
  0x35   :  { %v136_v32 = vadd.s32 1, %v132_v30 }
  0x36   :  { %vm135_vm9 = vc.u32 %v110_v29, %v129_v26  ;;  %v134_v17 = vadd.s32 %v129_v26, %v110_v29 }
  0x37   :  { %v137_v33 = vsel %vm135_vm9, %v136_v32, %v132_v30 }
  0x38   :  { %v138_v34 = vadd.s32 %v137_v33, %v133_v31 }
  0x3a   :  { %v139_v36 = vadd.s32 536870912, %v138_v34 }
  0x3c   :  { %v140_v37 = vshrl.u32 %v139_v36, 30 }
  0x3e   :  { %v141_v38 = vshll.u32 %v140_v37, 30  ;;  %v164_v55 = vsub.s32 4, %v140_v37 }
  0x40   :  { %v142_v39 = vsub.s32 %v138_v34, %v141_v38  ;;  %v165_v58 = vsel %vm42_vm12, %v164_v55, %v140_v37 }
  0x41   :  { %v167_v61 = vsel %vm41_vm13, 0, %v165_v58 }
  0x42   :  { %vm143_vm10 = vcmp.lt.s32.totalorder %v142_v39, 0  ;;  %v144_v40 = vsub.s32 0, %v142_v39  ;;  %v339_v2 = vadd.s32 3, %v167_v61  ;;  %v184_v8 = vand.u32 3, %v167_v61 }
  0x44   :  { %v145_v41 = vsel %vm143_vm10, %v144_v40, %v142_v39  ;;  %v340_v9 = vand.u32 3, %v339_v2  ;;  %vm189_vm14 = vcmp.eq.s32.totalorder %v184_v8, 2  ;;  %vm185_vm0 = vcmp.lt.s32.totalorder %v184_v8, 2 }
  0x45   :  { %v146_v42 = vclz %v145_v41  ;;  %vm186_vm1 = vcmp.eq.s32.totalorder %v184_v8, 0 }
  0x46   :  { %vm345_vm15 = vcmp.eq.s32.totalorder %v340_v9, 2  ;;  %vm342_vm2 = vcmp.eq.s32.totalorder %v340_v9, 0  ;;  %vm341_vm3 = vcmp.lt.s32.totalorder %v340_v9, 2 }
  0x47   :  { %v365_v43 = vadd.s32 4294967294, %v146_v42 }
  0x49   :  { %vm366_vm11 = vcmp.lt.s32.totalorder %v365_v43, 0 }
  0x4a   :  { %v149_v44 = vsel %vm366_vm11, 0, %v365_v43 }
  0x4b   :  { %v150_v45 = vsub.s32 32, %v149_v44  ;;  %v151_v46 = vshll.u32 %v142_v39, %v149_v44  ;;  %v154_v47 = vsub.s32 4294967266, %v149_v44 }
  0x4d   :  { %v152_v35 = vshrl.u32 %v134_v17, %v150_v45  ;;  %v155_v48 = vadd.s32 127, %v154_v47 }
  0x4f   :  { %v153_v49 = vor.u32 %v152_v35, %v151_v46  ;;  %v156_v50 = vshll.u32 %v155_v48, 23 }
  0x51   :  { %v157_v51 = vor.u32 4788187, %v156_v50  ;;  %v160_v52 = vcvt.s32.f32 %v153_v49 }
  0x53   :  { %v158_v53 = vand.u32 2147483647, %v157_v51 }
  0x55   :  { %v161_v54 = vmul.f32 %v160_v52, %v158_v53 }
  0x57   :  { %v162_v56 = vxor.u32 2147483648, %v161_v54 }
  0x59   :  { %v163_v57 = vsel %vm42_vm12, %v162_v56, %v161_v54 }
  0x5a   :  { %v166_v59 = vsel %vm41_vm13, %v437_v7, %v163_v57 }
  0x5b   :  { %v168_v60 = vmul.f32 %v166_v59, %v166_v59 }
  0x5d   :  { %v169_v62 = vmul.f32 -0.001358992, %v168_v60  ;;  %v176_v63 = vmul.f32 -0.00019511016, %v168_v60 }
  0x5f   :  { %v170_v0 = vadd.f32 0.041655596, %v169_v62  ;;  %v177_v1 = vadd.f32 0.008332121, %v176_v63 }
  0x61   :  { %v171_v3 = vmul.f32 %v170_v0, %v168_v60  ;;  %v178_v4 = vmul.f32 %v177_v1, %v168_v60 }
  0x63   :  { %v172_v5 = vadd.f32 -0.4999988, %v171_v3  ;;  %v179_v6 = vadd.f32 -0.16666654, %v178_v4 }
  0x65   :  { %v173_v11 = vmul.f32 %v172_v5, %v168_v60  ;;  %v180_v10 = vmul.f32 %v179_v6, %v168_v60 }
  0x67   :  { %v174_v12 = vadd.f32 1.0, %v173_v11  ;;  %v181_v13 = vadd.f32 1.0, %v180_v10 }
  0x69   :  { %v182_v14 = vmul.f32 %v181_v13, %v166_v59  ;;  %v190_v15 = vxor.u32 2147483648, %v174_v12 }
  0x6b   :  { %v187_v16 = vxor.u32 2147483648, %v182_v14  ;;  %v191_v18 = vsel %vm189_vm14, %v190_v15, %v182_v14  ;;  %v347_v19 = vsel %vm345_vm15, %v190_v15, %v182_v14 }
  0x6d   :  { %v188_v20 = vsel %vm186_vm1, %v174_v12, %v187_v16  ;;  %v344_v21 = vsel %vm342_vm2, %v174_v12, %v187_v16 }
  0x6e   :  { %v192_v22 = vsel %vm185_vm0, %v188_v20, %v191_v18  ;;  %v348_v23 = vsel %vm341_vm3, %v344_v21, %v347_v19 }
  0x6f   :  { %v193_v24 = vsel %vm183_vm4, nan, %v192_v22  ;;  %v349_v25 = vsel %vm183_vm4, nan, %v348_v23 }
  0x70   :  { %194 = vst [vmem:[%s495_s2] sm:$0xff] %v193_v24 }
  0x71   :  { %350 = vst [vmem:[%s496_s3] sm:$0xff] %v349_v25 }
  0x72   :  { %363 = vsyncpa [#allocation3], 1 }

</bundles_post_ra>
